<compile_context>
chip_gen: v5e
topology: v5e:2x2
jax: 0.10.0
libtpu: 0.0.40
codegen_flags: <defaults>
</compile_context>

<pallas_src>
import functools

import jax
import jax.numpy as jnp
from jax import lax
from jax.experimental import pallas as pl
from jax.experimental.pallas import tpu as pltpu

SCALE = 20.0
NORM_EPS = 1e-12          # torch.nn.functional.normalize default eps
_VMEM_BUDGET = 48 << 20   # keep working set under v7x's 64 MiB physical VMEM


def _round_up(x, m):
    return (x + m - 1) // m * m


def _main_vmem_bytes(tm, tn, D, itemsize):
    """Rough VMEM working-set estimate for the main scores kernel."""
    in_bufs = 2 * (tm * D + tn * D) * itemsize   # double-buffered input tiles
    out_bufs = 2 * (tm + tn) * 4                 # rowsum / colsum blocks
    work = 4 * tm * tn * 4                       # scores / exp f32 temporaries
    return in_bufs + out_bufs + work


# --------------------------------------------------------------------------
# Pre-pass: L2-normalize r1 and r2 (emitted in the MXU dtype) + diagonal
# scores diag_i = SCALE * <r1n_i, r2n_i>.  Memory-bound, one sweep over rows.
# --------------------------------------------------------------------------
def _prep_kernel(r1_ref, r2_ref, r1n_ref, r2n_ref, diag_ref):
    x1 = r1_ref[...].astype(jnp.float32)
    x2 = r2_ref[...].astype(jnp.float32)
    ss1 = jnp.sum(x1 * x1, axis=1, keepdims=True)
    ss2 = jnp.sum(x2 * x2, axis=1, keepdims=True)
    n1 = x1 * lax.rsqrt(jnp.maximum(ss1, NORM_EPS * NORM_EPS))
    n2 = x2 * lax.rsqrt(jnp.maximum(ss2, NORM_EPS * NORM_EPS))
    r1n_ref[...] = n1.astype(r1n_ref.dtype)
    r2n_ref[...] = n2.astype(r2n_ref.dtype)
    diag_ref[...] = SCALE * jnp.sum(n1 * n2, axis=1, keepdims=True)


# --------------------------------------------------------------------------
# Main tiled kernel: per (row-stripe i, col-tile j) score block
#   rowsum[i-stripe] += sum_j exp(s)         (output-resident over the j sweep)
#   colsum[i, j]      = sum_{rows in stripe} exp(s)   (per-stripe partial)
# Inputs arrive pre-normalized in the MXU dtype; no casts, no scratch.
# --------------------------------------------------------------------------
def _scores_kernel(r1n_ref, r2n_ref, rowsum_ref, colsum_ref):
    @pl.when(pl.program_id(1) == 0)
    def _():
        rowsum_ref[...] = jnp.zeros_like(rowsum_ref)

    # scores tile = SCALE * r1n @ r2n.T  (NT contraction, f32 accumulation)
    scores = lax.dot_general(
        r1n_ref[...], r2n_ref[...],
        dimension_numbers=(((1,), (1,)), ((), ())),
        preferred_element_type=jnp.float32) * SCALE

    # |scores| <= ~20 -> exp without max-subtraction is safe in f32.
    e = jnp.exp(scores)

    rowsum_ref[...] += jnp.sum(e, axis=1, keepdims=True)        # (tm, 1)
    colsum_ref[...] = jnp.sum(e, axis=0, keepdims=True)[None]   # (1, 1, tn)


@functools.partial(
    jax.jit,
    static_argnames=("block_rows", "block_cols", "matmul_dtype",
                     "vmem_limit_bytes"))
def symn_ranking_loss(r1, r2, *, block_rows=512, block_cols=256,
                      matmul_dtype=jnp.bfloat16, vmem_limit_bytes=None):
    """Symmetric MultipleNegativesRankingLoss; r1, r2: (B, D). Returns scalar f32."""
    assert r1.ndim == 2 and r1.shape == r2.shape
    assert block_cols % 128 == 0, "block_cols must be a multiple of 128"
    assert block_rows >= block_cols and block_rows % block_cols == 0
    B, D = r1.shape
    itemsize = jnp.dtype(matmul_dtype).itemsize

    # ---- tile selection -------------------------------------------------
    if B <= block_cols:
        # Single tile == full arrays (block shapes equal the array dims).
        tm = tn = pre = B
        Bp, pad = B, 0
    else:
        tn = block_cols
        pre = tn
        Bp = _round_up(B, tn)
        pad = Bp - B
        # Largest row stripe (multiple of tn, dividing Bp) that fits the
        # VMEM budget; falls back to tn.
        tm = tn
        for cand in range(block_rows, tn, -tn):
            if Bp % cand == 0 and _main_vmem_bytes(cand, tn, D, itemsize) <= _VMEM_BUDGET:
                tm = cand
                break
    n_i, n_j = Bp // tm, Bp // tn

    if vmem_limit_bytes is None:
        est = _main_vmem_bytes(tm, tn, D, itemsize)
        vmem_limit_bytes = min(max(int(1.25 * est), 32 << 20), 64 << 20)

    if pad:
        r1 = jnp.pad(r1, ((0, pad), (0, 0)))
        r2 = jnp.pad(r2, ((0, pad), (0, 0)))

    # ---- pre-pass: normalize once, emit in MXU dtype, diagonal scores ----
    r1n, r2n, diag = pl.pallas_call(
        _prep_kernel,
        out_shape=(
            jax.ShapeDtypeStruct((Bp, D), matmul_dtype),
            jax.ShapeDtypeStruct((Bp, D), matmul_dtype),
            jax.ShapeDtypeStruct((Bp, 1), jnp.float32),
        ),
        grid_spec=pltpu.PrefetchScalarGridSpec(
            num_scalar_prefetch=0,
            grid=(Bp // pre,),
            in_specs=[
                pl.BlockSpec((pre, D), lambda i: (i, 0)),
                pl.BlockSpec((pre, D), lambda i: (i, 0)),
            ],
            out_specs=[
                pl.BlockSpec((pre, D), lambda i: (i, 0)),
                pl.BlockSpec((pre, D), lambda i: (i, 0)),
                pl.BlockSpec((pre, 1), lambda i: (i, 0)),
            ],
        ),
        compiler_params=pltpu.CompilerParams(
            dimension_semantics=("parallel",),
            vmem_limit_bytes=vmem_limit_bytes),
    )(r1, r2)

    # ---- main kernel: tiled exp-score partial sums -----------------------
    rowsum, colsum_parts = pl.pallas_call(
        _scores_kernel,
        out_shape=(
            jax.ShapeDtypeStruct((Bp, 1), jnp.float32),     # sum_j exp(s_ij)
            jax.ShapeDtypeStruct((n_i, 1, Bp), jnp.float32),  # per-stripe col sums
        ),
        grid_spec=pltpu.PrefetchScalarGridSpec(
            num_scalar_prefetch=0,
            grid=(n_i, n_j),                                # (row stripes, col tiles)
            in_specs=[
                pl.BlockSpec((tm, D), lambda i, j: (i, 0)),   # r1n row stripe
                pl.BlockSpec((tn, D), lambda i, j: (j, 0)),   # r2n col tile
            ],
            out_specs=[
                pl.BlockSpec((tm, 1), lambda i, j: (i, 0)),
                pl.BlockSpec((1, 1, tn), lambda i, j: (i, 0, j)),
            ],
        ),
        compiler_params=pltpu.CompilerParams(
            # Row axis is independent (per-stripe partials only) -> safe to
            # shard across v7x's two TensorCores; col axis carries the
            # rowsum accumulator -> "arbitrary".
            dimension_semantics=("parallel", "arbitrary"),
            vmem_limit_bytes=vmem_limit_bytes),
    )(r1n, r2n)

    # ---- O(B) epilogue (fused by XLA) ------------------------------------
    rowsum = rowsum[:B, 0]
    colsum = jnp.sum(colsum_parts, axis=0)[0, :B]
    diag = diag[:B, 0]
    if pad:
        # Padded rows/cols are exact zero vectors -> scores 0 -> exp(0) = 1;
        # subtract their exact contribution instead of masking per tile.
        rowsum = rowsum - jnp.float32(pad)
        colsum = colsum - jnp.float32(pad)
    forward_loss = jnp.mean(jnp.log(rowsum) - diag)    # CE over rows
    backward_loss = jnp.mean(jnp.log(colsum) - diag)   # CE over columns
    return 0.5 * (forward_loss + backward_loss)


# --------------------------------------------------------------------------
# Pure-JAX reference mirroring the PyTorch module (high-precision matmul).
# --------------------------------------------------------------------------
def _reference_loss(r1, r2):
    r1n = r1 / jnp.maximum(jnp.linalg.norm(r1, axis=1, keepdims=True), NORM_EPS)
    r2n = r2 / jnp.maximum(jnp.linalg.norm(r2, axis=1, keepdims=True), NORM_EPS)
    scores = jnp.matmul(r1n, r2n.T, precision=lax.Precision.HIGHEST) * SCALE
    labels = jnp.arange(scores.shape[0])

    def ce(logits):
        lse = jax.scipy.special.logsumexp(logits, axis=1)
        tgt = jnp.take_along_axis(logits, labels[:, None], axis=1)[:, 0]
        return jnp.mean(lse - tgt)

    return (ce(scores) + ce(scores.T)) / 2.0


if __name__ == "__main__":
    key = jax.random.PRNGKey(0)

    def check(B, D, atol, rtol, **kw):
        k1, k2 = jax.random.split(jax.random.fold_in(key, B * 1000 + D))
        r1 = jax.random.normal(k1, (B, D), dtype=jnp.float32)
        r2 = jax.random.normal(k2, (B, D), dtype=jnp.float32)
        loss = jax.block_until_ready(symn_ranking_loss(r1, r2, **kw))
        ref = _reference_loss(r1, r2)
        assert jnp.isfinite(loss), (B, D, loss)
        assert jnp.allclose(loss, ref, rtol=rtol, atol=atol), (B, D, loss, ref)

    # Small shape consistent with the module (single-tile path, bf16 MXU).
    check(8, 32, 3e-2, 1e-2)
    # f32 escape hatch, tight tolerance (single-tile path).
    check(8, 32, 1e-4, 1e-4, matmul_dtype=jnp.float32)
    # Tiled path: 1x2 grid of 512x256 score tiles, no padding.
    check(512, 64, 3e-2, 1e-2)
    # Tiled + padded path: B=600 -> Bp=768, 3x3 grid, analytic pad correction.
    check(600, 48, 3e-2, 1e-2)

    print("KERNEL_OK")
</pallas_src>

<mosaic_0001>
module attributes {stable_mosaic.version = 11 : i64} {
  func.func @_prep_kernel(%arg0: i32, %arg1: memref<8x32xf32, #tpu.memory_space<vmem>>, %arg2: memref<8x32xf32, #tpu.memory_space<vmem>>, %arg3: memref<8x32xbf16, #tpu.memory_space<vmem>>, %arg4: memref<8x32xbf16, #tpu.memory_space<vmem>>, %arg5: memref<8x1xf32, #tpu.memory_space<vmem>>) attributes {dimension_semantics = [#tpu.dimension_semantics<parallel>], iteration_bounds = array<i64: 1>, scalar_prefetch = 0 : i64, scratch_operands = 0 : i64, tpu.core_type = #tpu.core_type<tc>, window_params = [{transform_indices = @transform_0, window_bounds = array<i64: 8, 32>}, {transform_indices = @transform_1, window_bounds = array<i64: 8, 32>}, {transform_indices = @transform_2, window_bounds = array<i64: 8, 32>}, {transform_indices = @transform_3, window_bounds = array<i64: 8, 32>}, {transform_indices = @transform_4, window_bounds = array<i64: 8, 1>}]} {
    %c0 = arith.constant 0 : index
    %c0_0 = arith.constant 0 : index
    %0 = vector.load %arg1[%c0, %c0_0] : memref<8x32xf32, #tpu.memory_space<vmem>>, vector<8x32xf32>
    %c0_1 = arith.constant 0 : index
    %c0_2 = arith.constant 0 : index
    %1 = vector.load %arg2[%c0_1, %c0_2] : memref<8x32xf32, #tpu.memory_space<vmem>>, vector<8x32xf32>
    %2 = arith.mulf %0, %0 : vector<8x32xf32>
    %cst = arith.constant dense<0.000000e+00> : vector<8xf32>
    %3 = vector.multi_reduction <add>, %2, %cst [1] : vector<8x32xf32> to vector<8xf32>
    %4 = vector.shape_cast %3 : vector<8xf32> to vector<8x1xf32>
    %5 = arith.mulf %1, %1 : vector<8x32xf32>
    %cst_3 = arith.constant dense<0.000000e+00> : vector<8xf32>
    %6 = vector.multi_reduction <add>, %5, %cst_3 [1] : vector<8x32xf32> to vector<8xf32>
    %7 = vector.shape_cast %6 : vector<8xf32> to vector<8x1xf32>
    %cst_4 = arith.constant 1.000000e-24 : f32
    %8 = vector.broadcast %cst_4 : f32 to vector<8x1xf32>
    %9 = arith.maximumf %4, %8 : vector<8x1xf32>
    %10 = math.rsqrt %9 : vector<8x1xf32>
    %11 = vector.broadcast %10 : vector<8x1xf32> to vector<8x32xf32>
    %12 = arith.mulf %0, %11 : vector<8x32xf32>
    %cst_5 = arith.constant 1.000000e-24 : f32
    %13 = vector.broadcast %cst_5 : f32 to vector<8x1xf32>
    %14 = arith.maximumf %7, %13 : vector<8x1xf32>
    %15 = math.rsqrt %14 : vector<8x1xf32>
    %16 = vector.broadcast %15 : vector<8x1xf32> to vector<8x32xf32>
    %17 = arith.mulf %1, %16 : vector<8x32xf32>
    %18 = arith.truncf %12 : vector<8x32xf32> to vector<8x32xbf16>
    %c0_6 = arith.constant 0 : index
    %c0_7 = arith.constant 0 : index
    %19 = vector.load %arg3[%c0_6, %c0_7] : memref<8x32xbf16, #tpu.memory_space<vmem>>, vector<8x32xbf16>
    tpu.vector_store %arg3[%c0_6, %c0_7], %18 {strides = array<i32>} : memref<8x32xbf16, #tpu.memory_space<vmem>>, vector<8x32xbf16>,
    %20 = arith.truncf %17 : vector<8x32xf32> to vector<8x32xbf16>
    %c0_8 = arith.constant 0 : index
    %c0_9 = arith.constant 0 : index
    %21 = vector.load %arg4[%c0_8, %c0_9] : memref<8x32xbf16, #tpu.memory_space<vmem>>, vector<8x32xbf16>
    tpu.vector_store %arg4[%c0_8, %c0_9], %20 {strides = array<i32>} : memref<8x32xbf16, #tpu.memory_space<vmem>>, vector<8x32xbf16>,
    %22 = arith.mulf %12, %17 : vector<8x32xf32>
    %cst_10 = arith.constant dense<0.000000e+00> : vector<8xf32>
    %23 = vector.multi_reduction <add>, %22, %cst_10 [1] : vector<8x32xf32> to vector<8xf32>
    %24 = vector.shape_cast %23 : vector<8xf32> to vector<8x1xf32>
    %cst_11 = arith.constant 2.000000e+01 : f32
    %25 = vector.broadcast %cst_11 : f32 to vector<8x1xf32>
    %26 = arith.mulf %25, %24 : vector<8x1xf32>
    %c0_12 = arith.constant 0 : index
    %c0_13 = arith.constant 0 : index
    %27 = vector.load %arg5[%c0_12, %c0_13] : memref<8x1xf32, #tpu.memory_space<vmem>>, vector<8x1xf32>
    tpu.vector_store %arg5[%c0_12, %c0_13], %26 {strides = array<i32>} : memref<8x1xf32, #tpu.memory_space<vmem>>, vector<8x1xf32>,
    return
  }
  func.func @transform_0(%arg0: i32) -> (i32, i32) {
    %c0_i32 = arith.constant 0 : i32
    %c0_i32_0 = arith.constant 0 : i32
    return %arg0, %c0_i32 : i32, i32
  }
  func.func @transform_1(%arg0: i32) -> (i32, i32) {
    %c0_i32 = arith.constant 0 : i32
    %c0_i32_0 = arith.constant 0 : i32
    return %arg0, %c0_i32 : i32, i32
  }
  func.func @transform_2(%arg0: i32) -> (i32, i32) {
    %c0_i32 = arith.constant 0 : i32
    %c0_i32_0 = arith.constant 0 : i32
    return %arg0, %c0_i32 : i32, i32
  }
  func.func @transform_3(%arg0: i32) -> (i32, i32) {
    %c0_i32 = arith.constant 0 : i32
    %c0_i32_0 = arith.constant 0 : i32
    return %arg0, %c0_i32 : i32, i32
  }
  func.func @transform_4(%arg0: i32) -> (i32, i32) {
    %c0_i32 = arith.constant 0 : i32
    %c0_i32_0 = arith.constant 0 : i32
    return %arg0, %c0_i32 : i32, i32
  }
}

module attributes {stable_mosaic.version = 11 : i64} {
  func.func @_scores_kernel(%arg0: i32, %arg1: i32, %arg2: memref<8x32xbf16, #tpu.memory_space<vmem>>, %arg3: memref<8x32xbf16, #tpu.memory_space<vmem>>, %arg4: memref<8x1xf32, #tpu.memory_space<vmem>>, %arg5: memref<1x1x8xf32, #tpu.memory_space<vmem>>) attributes {dimension_semantics = [#tpu.dimension_semantics<parallel>, #tpu.dimension_semantics<arbitrary>], iteration_bounds = array<i64: 1, 1>, scalar_prefetch = 0 : i64, scratch_operands = 0 : i64, tpu.core_type = #tpu.core_type<tc>, window_params = [{transform_indices = @transform_0, window_bounds = array<i64: 8, 32>}, {transform_indices = @transform_1, window_bounds = array<i64: 8, 32>}, {transform_indices = @transform_2, window_bounds = array<i64: 8, 1>}, {transform_indices = @transform_3, window_bounds = array<i64: 1, 1, 8>}]} {
    %c0_i32 = arith.constant 0 : i32
    %0 = arith.cmpi eq, %arg1, %c0_i32 : i32
    %1 = arith.extui %0 : i1 to i32
    %c0_i32_0 = arith.constant 0 : i32
    %2 = arith.cmpi ne, %1, %c0_i32_0 : i32
    scf.if %2 {
      %cst_14 = arith.constant 0.000000e+00 : f32
      %18 = vector.broadcast %cst_14 : f32 to vector<8x1xf32>
      %c0_15 = arith.constant 0 : index
      %c0_16 = arith.constant 0 : index
      %19 = vector.load %arg4[%c0_15, %c0_16] : memref<8x1xf32, #tpu.memory_space<vmem>>, vector<8x1xf32>
      tpu.vector_store %arg4[%c0_15, %c0_16], %18 {strides = array<i32>} : memref<8x1xf32, #tpu.memory_space<vmem>>, vector<8x1xf32>,
    } else {
    }
    %c0 = arith.constant 0 : index
    %c0_1 = arith.constant 0 : index
    %3 = vector.load %arg2[%c0, %c0_1] : memref<8x32xbf16, #tpu.memory_space<vmem>>, vector<8x32xbf16>
    %c0_2 = arith.constant 0 : index
    %c0_3 = arith.constant 0 : index
    %4 = vector.load %arg3[%c0_2, %c0_3] : memref<8x32xbf16, #tpu.memory_space<vmem>>, vector<8x32xbf16>
    %cst = arith.constant dense<0.000000e+00> : vector<8x8xf32>
    %5 = tpu.matmul %3, %4, %cst {dimension_numbers = #tpu.dot_dimension_numbers<[1], [1], [0], [0], [0, 0, 1, 0], [], []>} : vector<8x32xbf16>, vector<8x32xbf16>, vector<8x8xf32> -> vector<8x8xf32>
    %cst_4 = arith.constant 2.000000e+01 : f32
    %6 = vector.broadcast %cst_4 : f32 to vector<8x8xf32>
    %7 = arith.mulf %5, %6 : vector<8x8xf32>
    %8 = math.exp %7 : vector<8x8xf32>
    %c0_5 = arith.constant 0 : index
    %c0_6 = arith.constant 0 : index
    %9 = vector.load %arg4[%c0_5, %c0_6] : memref<8x1xf32, #tpu.memory_space<vmem>>, vector<8x1xf32>
    %cst_7 = arith.constant dense<0.000000e+00> : vector<8xf32>
    %10 = vector.multi_reduction <add>, %8, %cst_7 [1] : vector<8x8xf32> to vector<8xf32>
    %11 = vector.shape_cast %10 : vector<8xf32> to vector<8x1xf32>
    %12 = arith.addf %9, %11 : vector<8x1xf32>
    %c0_8 = arith.constant 0 : index
    %c0_9 = arith.constant 0 : index
    %13 = vector.load %arg4[%c0_8, %c0_9] : memref<8x1xf32, #tpu.memory_space<vmem>>, vector<8x1xf32>
    tpu.vector_store %arg4[%c0_8, %c0_9], %12 {strides = array<i32>} : memref<8x1xf32, #tpu.memory_space<vmem>>, vector<8x1xf32>,
    %cst_10 = arith.constant dense<0.000000e+00> : vector<8xf32>
    %14 = vector.multi_reduction <add>, %8, %cst_10 [0] : vector<8x8xf32> to vector<8xf32>
    %15 = vector.shape_cast %14 : vector<8xf32> to vector<1x8xf32>
    %16 = vector.shape_cast %15 : vector<1x8xf32> to vector<1x1x8xf32>
    %c0_11 = arith.constant 0 : index
    %c0_12 = arith.constant 0 : index
    %c0_13 = arith.constant 0 : index
    %17 = vector.load %arg5[%c0_11, %c0_12, %c0_13] : memref<1x1x8xf32, #tpu.memory_space<vmem>>, vector<1x1x8xf32>
    tpu.vector_store %arg5[%c0_11, %c0_12, %c0_13], %16 {strides = array<i32>} : memref<1x1x8xf32, #tpu.memory_space<vmem>>, vector<1x1x8xf32>,
    return
  }
  func.func @transform_0(%arg0: i32, %arg1: i32) -> (i32, i32) {
    %c0_i32 = arith.constant 0 : i32
    %c0_i32_0 = arith.constant 0 : i32
    return %arg0, %c0_i32 : i32, i32
  }
  func.func @transform_1(%arg0: i32, %arg1: i32) -> (i32, i32) {
    %c0_i32 = arith.constant 0 : i32
    %c0_i32_0 = arith.constant 0 : i32
    return %arg1, %c0_i32 : i32, i32
  }
  func.func @transform_2(%arg0: i32, %arg1: i32) -> (i32, i32) {
    %c0_i32 = arith.constant 0 : i32
    %c0_i32_0 = arith.constant 0 : i32
    return %arg0, %c0_i32 : i32, i32
  }
  func.func @transform_3(%arg0: i32, %arg1: i32) -> (i32, i32, i32) {
    %c0_i32 = arith.constant 0 : i32
    %c0_i32_0 = arith.constant 0 : i32
    return %arg0, %c0_i32, %arg1 : i32, i32, i32
  }
}

</mosaic_0001>

<bundles_post_ra>
// kernel: symn_ranking_loss.2
= control target key start
LH: loop header
LB: loop body
LE: loop exit
PB: predicated region body
PF: predicated region fallthrough
CT: control target
= control target key end

     0   :  { %10 = vsyncpa [#allocation3], 0  ;;  %s206_s0 = inlined_call_operand.hbm [shape: f32[8,32], index: 0, kind: input, shape index: {}]   ;;  %s207_s1 = inlined_call_operand.hbm [shape: f32[8,32], index: 1, kind: input, shape index: {}]   ;;  %s208_s2 = inlined_call_operand.vmem [shape: bf16[8,32], index: 2, kind: output, shape index: {0}]   ;;  %s209_s3 = inlined_call_operand.vmem [shape: bf16[8,32], index: 3, kind: output, shape index: {1}]   ;;  %s210_s4 = inlined_call_operand.vmem [shape: f32[8,1], index: 4, kind: output, shape index: {2}]  }
   0x1   :  { %s17_s17 = sshll.u32 %s206_s0, 4  ;;  %s18_s17 = int_to_ptr.hbm [resolvable:$true] %s17_s17 }
   0x2   :  { %11 = vsyncpa [#allocation5], 0  ;;  %s161_s18 = smov [#allocation2]   ;;  %s28_s22 = sshll.u32 %s207_s1, 4  ;;  %s29_s22 = int_to_ptr.hbm [resolvable:$true] %s28_s22 }
   0x3   :  { %s19_s19 = sshll.u32 %s161_s18, 4  ;;  %s162_s23 = smov [#allocation4]   ;;  %s20_s19 = int_to_ptr.vmem [resolvable:$true] %s19_s19 }
   0x4   :  { %22 = dma.hbm_to_vmem [thread:$0]  %s18_s17, 128, %s20_s19, [#allocation3]  }
   0x5   :  { %s30_s24 = sshll.u32 %s162_s23, 4  ;;  %s31_s24 = int_to_ptr.vmem [resolvable:$true] %s30_s24 }
   0x6   :  { %33 = dma.hbm_to_vmem [thread:$0]  %s29_s22, 128, %s31_s24, [#allocation5]  }
   0x7   :  { %157 = dma.done.wait [#allocation3], 128  }
   0x8   :  { %158 = vsyncadd [#allocation3], 4294967168 }
   0x9   :  { %159 = dma.done.wait [#allocation5], 128  }
   0xa   :  { %160 = vsyncadd [#allocation5], 4294967168  ;;  %v42_v0 = vld [vmem:[#allocation2] sm:$0xff]  ;;  %vm45_vm0 = vcmask 261120   ;;  %v43_v2 = vld [vmem:[#allocation4] sm:$0xff]  ;;  %vm78_vm4 = vcmask 257024  }
   0xb   :  { %v44_v1 = vmul.f32 %v42_v0, %v42_v0  ;;  %v49_v4 = vmul.f32 %v43_v2, %v43_v2  ;;  %vm87_vm8 = vcmask 7168  }
   0xd   :  { %v46_v3 = vsel %vm45_vm0, %v44_v1, 0.0  ;;  %v50_v5 = vsel %vm45_vm0, %v49_v4, 0.0 }
   0xe   :  { %47 = vadd.xlane.f32.xlu0 %v46_v3 }
  0x16   :  { %51 = vadd.xlane.f32.xlu0 %v50_v5 }
  0x81   :  { %v48_v6 = vpop.xlane.xlu0 %47 }
  0x82   :  { %v53_v7 = vmax.f32 %v48_v6, 1e-24 }
  0x84   :  { %105 = vrsqrt.f32 %v53_v7  ;;  %vm60_vm2 = vweird.f32 %v53_v7 }
  0x89   :  { %v52_v8 = vpop.xlane.xlu0 %51 }
  0x8a   :  { %v106_v9 = vpop.eup %105  ;;  %v65_v10 = vmax.f32 %v52_v8, 1e-24 }
  0x8b   :  { %v55_v11 = vmul.f32 %v106_v9, %v53_v7  ;;  %vm61_vm1 = vweird.f32 %v106_v9 }
  0x8c   :  { %107 = vrsqrt.f32 %v65_v10  ;;  %vm62_vm3 = vmor %vm60_vm2, %vm61_vm1  ;;  %vm72_vm6 = vweird.f32 %v65_v10 }
  0x8d   :  { %v56_v12 = vmul.f32 %v106_v9, %v55_v11 }
  0x8f   :  { %v57_v13 = vmul.f32 0.5, %v56_v12 }
  0x91   :  { %v58_v14 = vsub.f32 1.5, %v57_v13 }
  0x92   :  { %v108_v15 = vpop.eup %107 }
  0x93   :  { %v67_v16 = vmul.f32 %v108_v15, %v65_v10  ;;  %v59_v17 = vmul.f32 %v106_v9, %v58_v14  ;;  %vm73_vm5 = vweird.f32 %v108_v15 }
  0x94   :  { %vm74_vm7 = vmor %vm72_vm6, %vm73_vm5 }
  0x95   :  { %v68_v18 = vmul.f32 %v108_v15, %v67_v16  ;;  %v63_v19 = vsel %vm62_vm3, %v106_v9, %v59_v17 }
  0x96   :  { %v64_v20 = vmul.f32 %v63_v19, %v42_v0 }
  0x97   :  { %v69_v21 = vmul.f32 0.5, %v68_v18 }
  0x98   :  { %v77_v22 = vpack.c.bf16 %v64_v20, %v64_v20 }
  0x99   :  { %v70_v23 = vsub.f32 1.5, %v69_v21 }
  0x9a   :  { %79 = vst.msk [vmem:[%s208_s2] sm:$0xf] %vm78_vm4, %v77_v22 }
  0x9b   :  { %v71_v24 = vmul.f32 %v108_v15, %v70_v23 }
  0x9d   :  { %v75_v25 = vsel %vm74_vm7, %v108_v15, %v71_v24 }
  0x9e   :  { %v76_v26 = vmul.f32 %v75_v25, %v43_v2 }
  0xa0   :  { %v82_v27 = vmul.f32 %v76_v26, %v64_v20  ;;  %v80_v28 = vpack.c.bf16 %v76_v26, %v76_v26 }
  0xa2   :  { %v83_v29 = vsel %vm45_vm0, %v82_v27, 0.0  ;;  %81 = vst.msk [vmem:[%s209_s3] sm:$0xf] %vm78_vm4, %v80_v28 }
  0xa3   :  { %84 = vadd.xlane.f32.xlu1 %v83_v29 }
 0x116   :  { %v85_v30 = vpop.xlane.xlu1 %84 }
 0x117   :  { %v86_v31 = vmul.f32 20.0, %v85_v30 }
 0x119   :  { %88 = vst.msk [vmem:[%s210_s4] sm:$0xff] %vm87_vm8, %v86_v31 }
 0x11a   :  { %101 = vsyncpa [#allocation3], 1 }
 0x11b   :  { %102 = vsyncpa [#allocation5], 1 }

// kernel: symn_ranking_loss.3
= control target key start
LH: loop header
LB: loop body
LE: loop exit
PB: predicated region body
PF: predicated region fallthrough
CT: control target
= control target key end

     0   :  { %vm22_vm0 = vcmask 261120   ;;  %vm18_vm1 = vcmask 7168   ;;  %v73_v3 = vmov 0.0   ;;  %vm46_vm2 = vcmask 64512   ;;  %s114_s1 = inlined_call_operand.vmem [shape: bf16[8,32], index: 1, kind: input, shape index: {}]   ;;  %s115_s0 = inlined_call_operand.vmem [shape: bf16[8,32], index: 0, kind: input, shape index: {}]   ;;  %s116_s2 = inlined_call_operand.vmem [shape: f32[8,1], index: 2, kind: output, shape index: {0}]   ;;  %s117_s3 = inlined_call_operand.vmem [shape: f32[1,1,8], index: 3, kind: output, shape index: {1}]  }
   0x1   :  { %v21_v0 = vld [vmem:[%s114_s1] sm:$0xf]  ;;  %19 = vst.msk [vmem:[%s116_s2] sm:$0xff] %vm18_vm1, %v73_v3  ;;  %vm59_vm3 = vcmask 57344  }
   0x2   :  { %v27_v1 = vsel %vm22_vm0, %v21_v0, 0  ;;  %v20_v2 = vld [vmem:[%s115_s0] sm:$0xf] }
   0x3   :  { %36 = vmatpush.bf16.xpose.msra.mxu0 %v27_v1 }
   0x8   :  { %v45_v16 = vld [vmem:[%s116_s2] sm:$0xff] }
   0xa   :  { %69 = vmatmul.msk.bf16.vlgmr.msra.gmra.mxu0 %vm22_vm0, %v20_v2 }
  0x87   :  { %v38_v4 = vpop.f32.mrf.mxu0 }
  0x88   :  { %v42_v5 = vmul.f32 20.0, %v38_v4 }
  0x8a   :  { %v43_v6 = vmul.f32 1.442695, %v42_v5 }
  0x8c   :  { %71 = vpow2.f32 %v43_v6 }
  0x8f   :  { %v40_v7 = vpop.f32.mrf.mxu0 }
  0x92   :  { %v72_v8 = vpop.eup %71 }
  0x93   :  { %v47_v9 = vsel %vm46_vm2, %v72_v8, 0.0 }
  0x94   :  { %48 = vadd.xlane.f32.xlu0 %v47_v9  ;;  %v53_v10 = vrot.slane %v47_v9, 4 }
  0x96   :  { %v54_v11 = vadd.f32 %v53_v10, %v47_v9 }
  0x98   :  { %v55_v12 = vrot.slane %v54_v11, 2 }
  0x9a   :  { %v56_v13 = vadd.f32 %v55_v12, %v54_v11 }
  0x9c   :  { %v57_v14 = vrot.slane %v56_v13, 1 }
  0x9e   :  { %v58_v15 = vadd.f32 %v57_v14, %v56_v13 }
  0xa0   :  { %60 = vst.msk [vmem:[%s117_s3] sm:$0x1] %vm59_vm3, %v58_v15 }
 0x107   :  { %v49_v17 = vpop.xlane.xlu0 %48 }
 0x108   :  { %v50_v18 = vadd.f32 %v49_v17, %v45_v16 }
 0x10a   :  { %52 = vst.msk [vmem:[%s116_s2] sm:$0xff] %vm18_vm1, %v50_v18 }

</bundles_post_ra>
